<compile_context>
chip_gen: v6e
topology: v6e:2x2x1
jax: 0.10.0
libtpu: 0.0.40
codegen_flags: <defaults>
</compile_context>

<pallas_src>
import jax
import jax.numpy as jnp
from jax.experimental import pallas as pl
from jax.experimental.pallas import tpu as pltpu


# ----------------------------- kernels ---------------------------------------


def _maxout_acc_kernel(x_ref, o_ref):
    """Max-accumulate over the innermost (pool) grid axis.

    x_ref: (TR, TM) lane-dense tile of one pool slice.
    o_ref: (TR, TM) output tile; resident in VMEM across the pool axis.
    """
    k = pl.program_id(2)

    @pl.when(k == 0)
    def _init():
        o_ref[...] = x_ref[...]

    @pl.when(k != 0)
    def _accum():
        o_ref[...] = jnp.maximum(o_ref[...], x_ref[...])


def _maxout_small_kernel(x_ref, o_ref):
    """Compatibility path: (pool, H, W) tile, reduce over the leading axis."""
    o_ref[...] = jnp.max(x_ref[...], axis=0)


# -------------------------- tiling helpers ------------------------------------


def _pick_tile(total, unit, target):
    """Largest multiple of `unit` that divides `total` and is <= target (>= unit)."""
    best = unit
    cap = max(unit, min(total, target))
    t = unit
    while t <= cap:
        if total % t == 0:
            best = t
        t += unit
    return best


# ----------------------------- wrapper -----------------------------------------


def maxout(x, pool_size, *, target_block_bytes=2 * 1024 * 1024, target_lane_tile=2048):
    """Maxout over channel groups. x: (B, C, H, W) with C % pool_size == 0."""
    B, C, H, W = x.shape
    assert C % pool_size == 0, "channels must be divisible by pool_size"
    Cout = C // pool_size
    if pool_size == 1:
        return x  # degenerate: max over a singleton axis is the identity

    R = B * Cout
    HW = H * W
    itemsize = jnp.dtype(x.dtype).itemsize

    if HW % 128 != 0:
        # ---- compatibility path (rare: spatial size not lane-aligned) -------
        x5 = x.reshape(B, Cout, pool_size, H, W)  # free view
        in_spec = pl.BlockSpec(
            (pl.Squeezed(), pl.Squeezed(), pool_size, H, W),
            lambda b, c: (b, c, 0, 0, 0),
        )
        out_spec = pl.BlockSpec(
            (pl.Squeezed(), pl.Squeezed(), H, W),
            lambda b, c: (b, c, 0, 0),
        )
        return pl.pallas_call(
            _maxout_small_kernel,
            out_shape=jax.ShapeDtypeStruct((B, Cout, H, W), x.dtype),
            grid_spec=pltpu.PrefetchScalarGridSpec(
                num_scalar_prefetch=0,
                grid=(B, Cout),
                in_specs=[in_spec],
                out_specs=out_spec,
            ),
            compiler_params=pltpu.CompilerParams(
                dimension_semantics=("parallel", "parallel"),
            ),
        )(x5)

    # ---- lane-dense fast path ------------------------------------------------
    if R % 8 == 0:
        # Lane tile first (multiple of 128, up to target_lane_tile), then rows to
        # hit ~target_block_bytes. Rows prefer multiples of 32 so bf16/int8
        # inputs also stay unpadded along sublanes.
        TM = _pick_tile(HW, 128, target_lane_tile)
        row_unit = 32 if R % 32 == 0 else 8
        row_cap = max(row_unit, target_block_bytes // (TM * itemsize))
        TR = _pick_tile(R, row_unit, row_cap)
    else:
        # Row count not sublane-aligned: take the full row extent (always legal
        # for the second-to-last block dim) and bound the block via the lane tile.
        TR = R
        TM = _pick_tile(HW, 128, max(128, target_block_bytes // (TR * itemsize)))

    lane_blocks = HW // TM
    grid = (R // TR, lane_blocks, pool_size)

    x2 = x.reshape(R, pool_size * HW)  # free view of contiguous NCHW

    # Input: lane-tile m of pool slice k sits at column-block k*lane_blocks + m.
    in_spec = pl.BlockSpec((TR, TM), lambda r, m, k: (r, k * lane_blocks + m))
    # Output: same block across k -> resident VMEM accumulator, written to HBM once.
    out_spec = pl.BlockSpec((TR, TM), lambda r, m, k: (r, m))

    out2 = pl.pallas_call(
        _maxout_acc_kernel,
        out_shape=jax.ShapeDtypeStruct((R, HW), x.dtype),
        grid_spec=pltpu.PrefetchScalarGridSpec(
            num_scalar_prefetch=0,
            grid=grid,
            in_specs=[in_spec],
            out_specs=out_spec,
        ),
        compiler_params=pltpu.CompilerParams(
            dimension_semantics=("parallel", "parallel", "arbitrary"),
        ),
    )(x2)
    return out2.reshape(B, Cout, H, W)


# ------------------------------ self-test ---------------------------------------


def _reference(x, pool_size):
    B, C, H, W = x.shape
    return jnp.max(x.reshape(B, C // pool_size, pool_size, H, W), axis=2)


if __name__ == "__main__":
    pool_size = 2
    key = jax.random.PRNGKey(0)

    # Small NCHW input consistent with the module: (batch=2, channels=4, 16, 16).
    x = jax.random.normal(key, (2, 4, 16, 16), dtype=jnp.float32)
    out = jax.block_until_ready(maxout(x, pool_size))
    ref = _reference(x, pool_size)
    assert out.shape == ref.shape == (2, 2, 16, 16)
    assert out.dtype == x.dtype
    assert jnp.allclose(out, ref), "Pallas maxout mismatch vs reference"

    # Extra check that exercises a multi-block grid (tiny tiles forced on purpose).
    x_b = jax.random.normal(jax.random.PRNGKey(1), (2, 8, 16, 32), dtype=jnp.float32)
    out_b = jax.block_until_ready(
        maxout(x_b, pool_size, target_block_bytes=16 * 1024, target_lane_tile=128)
    )
    assert jnp.allclose(out_b, _reference(x_b, pool_size)), "tiled-grid mismatch"

    print("KERNEL_OK")
</pallas_src>

<mosaic_0001>
module attributes {stable_mosaic.version = 11 : i64} {
  func.func @_maxout_acc_kernel(%arg0: i32, %arg1: i32, %arg2: i32, %arg3: memref<4x256xf32, #tpu.memory_space<vmem>>, %arg4: memref<4x256xf32, #tpu.memory_space<vmem>>) attributes {dimension_semantics = [#tpu.dimension_semantics<parallel>, #tpu.dimension_semantics<parallel>, #tpu.dimension_semantics<arbitrary>], iteration_bounds = array<i64: 1, 1, 2>, scalar_prefetch = 0 : i64, scratch_operands = 0 : i64, tpu.core_type = #tpu.core_type<tc>, window_params = [{transform_indices = @transform_0, window_bounds = array<i64: 4, 256>}, {transform_indices = @transform_1, window_bounds = array<i64: 4, 256>}]} {
    %c0_i32 = arith.constant 0 : i32
    %0 = arith.cmpi eq, %arg2, %c0_i32 : i32
    %1 = arith.extui %0 : i1 to i32
    %c0_i32_0 = arith.constant 0 : i32
    %2 = arith.cmpi ne, %1, %c0_i32_0 : i32
    scf.if %2 {
      %c0 = arith.constant 0 : index
      %c0_3 = arith.constant 0 : index
      %6 = vector.load %arg3[%c0, %c0_3] : memref<4x256xf32, #tpu.memory_space<vmem>>, vector<4x256xf32>
      %c0_4 = arith.constant 0 : index
      %c0_5 = arith.constant 0 : index
      %7 = vector.load %arg4[%c0_4, %c0_5] : memref<4x256xf32, #tpu.memory_space<vmem>>, vector<4x256xf32>
      tpu.vector_store %arg4[%c0_4, %c0_5], %6 {strides = array<i32>} : memref<4x256xf32, #tpu.memory_space<vmem>>, vector<4x256xf32>,
    } else {
    }
    %c0_i32_1 = arith.constant 0 : i32
    %3 = arith.cmpi ne, %arg2, %c0_i32_1 : i32
    %4 = arith.extui %3 : i1 to i32
    %c0_i32_2 = arith.constant 0 : i32
    %5 = arith.cmpi ne, %4, %c0_i32_2 : i32
    scf.if %5 {
      %c0 = arith.constant 0 : index
      %c0_3 = arith.constant 0 : index
      %6 = vector.load %arg4[%c0, %c0_3] : memref<4x256xf32, #tpu.memory_space<vmem>>, vector<4x256xf32>
      %c0_4 = arith.constant 0 : index
      %c0_5 = arith.constant 0 : index
      %7 = vector.load %arg3[%c0_4, %c0_5] : memref<4x256xf32, #tpu.memory_space<vmem>>, vector<4x256xf32>
      %8 = arith.maximumf %6, %7 : vector<4x256xf32>
      %c0_6 = arith.constant 0 : index
      %c0_7 = arith.constant 0 : index
      %9 = vector.load %arg4[%c0_6, %c0_7] : memref<4x256xf32, #tpu.memory_space<vmem>>, vector<4x256xf32>
      tpu.vector_store %arg4[%c0_6, %c0_7], %8 {strides = array<i32>} : memref<4x256xf32, #tpu.memory_space<vmem>>, vector<4x256xf32>,
    } else {
    }
    return
  }
  func.func @transform_0(%arg0: i32, %arg1: i32, %arg2: i32) -> (i32, i32) {
    %c1_i32 = arith.constant 1 : i32
    %0 = arith.muli %arg2, %c1_i32 : i32
    %1 = arith.addi %0, %arg1 : i32
    %c0_i32 = arith.constant 0 : i32
    return %arg0, %1 : i32, i32
  }
  func.func @transform_1(%arg0: i32, %arg1: i32, %arg2: i32) -> (i32, i32) {
    %c0_i32 = arith.constant 0 : i32
    return %arg0, %arg1 : i32, i32
  }
}

</mosaic_0001>

<bundles_post_ra>
// kernel: tpu_custom_call.1
= control target key start
LH: loop header
LB: loop body
LE: loop exit
PB: predicated region body
PF: predicated region fallthrough
CT: control target
= control target key end

     0   :  { %6 = vsyncpa [#allocation3], 0  ;;  %s567_s0 = inlined_call_operand.hbm [shape: f32[4,512], index: 0, kind: input, shape index: {}]   ;;  %s568_s1 = inlined_call_operand.hbm [shape: f32[4,256], index: 1, kind: output, shape index: {}]  }
   0x1   :  { %8 = vsyncpa [#allocation3 + $0x1], 0 }
   0x2   :  { %9 = vsyncpa [#allocation4], 0  ;;  %s451_s6 = smov 0   ;;  %s453_s7 = smov 0  }
   0x3   :  { %s455_s8 = smov 0   ;;  %s457_s9 = smov 0  }
   0x4   :  { %s459_s10 = smov 0   ;;  %s461_s11 = smov 0  }
   0x5 LB: > { %s254_s12 = sadd.s32 4294967295, %s437_s11   ;;  %s27_s13 = sadd.s32 1, %s433_s10  ;;  %s437_s11 = sphi %s461_s11, %s15_s11   ;;  %s433_s10 = sphi %s459_s10, %s577_s10   ;;  %s429_s9 = sphi %s457_s9, %s576_s9   ;;  %s425_s8 = sphi %s455_s8, %s575_s8   ;;  %s421_s7 = sphi %s453_s7, %s574_s7   ;;  %s417_s6 = sphi %s451_s6, %s573_s6  }
   0x6   : > { %p28_p0 = scmp.ge.s32.totalorder %s27_s13, 2  ;;  %s45_s14 = sadd.s32 1, %s425_s8 }
   0x7   : > { %p52_p1 = scmp.ne.s32.totalorder %s425_s8, %s421_s7  ;;  %p53_p2 = scmp.eq.s32.totalorder %s437_s11, 0 }
   0x8   : > { %s579_s13 = smov (%p28_p0, %s27_s13), 0  ;;  %p58_p4 = scmp.ne.s32.totalorder %s421_s7, %s417_s6 }
   0x9   : > { %p487_p3 = por %p53_p2, %p52_p1  ;;  %s41_s16 = ssub.s32 %s433_s10, %s579_s13 }
   0xa   : > { %p59_p5 = scmp.eq.s32.totalorder %s254_s12, 0  ;;  %p43_p6 = scmp.eq.s32.totalorder %s41_s16, 0 }
   0xb   : > { %p279_p8 = scmp.lt.s32.totalorder %s437_s11, 2  ;;  %s110_s19 = sand.u32 1, %s425_s8  }
   0xc   : > { %p496_p7 = por %p59_p5, %p58_p4  ;;  %s268_s20 = sshll.u32 %s433_s10, 7 }
   0xd   : > { %s502_s18 = scalar_select %p43_p6, %s425_s8, %s45_s14  }
   0xe   : > { %s257_s21 = sshll.u32 %s110_s19, 3  ;;  %s123_s24 = scalar_lea.hbm %s567_s0, %s268_s20 }
   0xf   : > { %s114_s25 = scalar_lea.vmem [#allocation2], %s257_s21  ;;  %p511_p9 = pnand %p279_p8, %p487_p3 }
  0x10   : > { %s125_s26 = sshll.u32 %s114_s25, 4  ;;  %p260_p10 = scmp.ge.s32.totalorder %s437_s11, 1  ;;  %s126_s26 = int_to_ptr.vmem [resolvable:$true] %s125_s26 }
  0x11   : > { %p130_p11 = scmp.lt.s32.totalorder %s437_s11, 3  ;;  %s111_s28 = scalar_lea.sflag [#allocation3], %s110_s19 }
  0x12   : > { %p333_p12 = pneg %p511_p9  ;;  %s344_s29 = scalar_lea.vmem %s126_s26, 128 }
  0x13   : > { %p345_p13 = scmp.ne.s32.totalorder %s126_s26, %s344_s29  ;;  %s439_s30 = smov [#allocation2]  }
  0x14   : > { %s349_s2 = sshll.u32 %s439_s30, 4  ;;  %s350_s2 = int_to_ptr.vmem [resolvable:$false] %s349_s2 }
  0x15   : > { %p347_p0 = pnand %p345_p13, %p333_p12  ;;  %s351_s3 = scalar_lea.vmem %s350_s2, 256 }
  0x16   : > { %p352_p2 = scmp.lt.s32.totalorder %s126_s26, %s350_s2  ;;  %p353_p3 = scmp.lt.s32.totalorder %s351_s3, %s344_s29 }
  0x17   : > { %p348_p1 = pneg %p347_p0 }
  0x18   : > { %p354_p4 = por %p353_p3, %p352_p2 }
  0x1a   : > { %p355_p5 = pnand %p354_p4, %p348_p1 }
  0x1c   : > { %358 = shalt.err (!%p355_p5)
}
  0x1d   : > { %278 = dma.hbm_to_vmem [thread:$0]  (!%p511_p9), %s123_s24, 128, %s126_s26, %s111_s28  }
  0x1e   : > { %p131_p6 = pnand %p260_p10, %p130_p11 }
  0x1f   : > { %s136_s4 = sand.u32 (!%p131_p6), 1, %s421_s7  }
  0x20   : > { %134 = sbr.rel (%p131_p6) target bundleno = 73 (0x49), region = 24  ;;  %s261_s5 = sshll.u32 (!%p131_p6), %s136_s4, 3 }
  0x21   : > { %s137_s6 = scalar_lea.sflag (!%p131_p6), [#allocation3], %s136_s4  ;;  %s140_s14 = scalar_lea.vmem (!%p131_p6), [#allocation2], %s261_s5 }
  0x25   : > { %408 = dma.done.wait (%p496_p7), %s137_s6, 128  }
  0x26   : > { %410 = vsyncadd (%p496_p7), %s137_s6, 4294967168  ;;  %p262_p8 = scmp.ne.s32.totalorder %s429_s9, 0 }
  0x28   : > { %160 = sbr.rel (%p262_p8) target bundleno = 47 (0x2f), region = 32 }
  0x2d   : > { %v161_v0 = vld [vmem:[%s140_s14] sm:$0xff] }
  0x2e   : > { %162 = vst [vmem:[#allocation5] sm:$0xff] %v161_v0 }
  0x2f PF: > { %p263_p9 = scmp.eq.s32.totalorder %s429_s9, 0 }
  0x31   : > { %166 = sbr.rel (%p263_p9) target bundleno = 58 (0x3a), region = 36 }
  0x36   : > { %v167_v1 = vld [vmem:[#allocation5] sm:$0xff]  ;;  %v168_v2 = vld [vmem:[%s140_s14] sm:$0xff] }
  0x37   : > { %v169_v3 = vmax.f32 %v167_v1, %v168_v2 }
  0x39   : > { %170 = vst [vmem:[#allocation5] sm:$0xff] %v169_v3 }
  0x3a PF: > { %p534_p10 = scmp.eq.s32.totalorder %s254_s12, 1  ;;  %s440_s16 = smov [#allocation5]  }
  0x3b   : > { %s183_s17 = sshll.u32 %s440_s16, 4  ;;  %s184_s17 = int_to_ptr.vmem [resolvable:$true] %s183_s17 }
  0x3c   : > { %s359_s19 = scalar_lea.vmem %s184_s17, 128  ;;  %p366_p13 = scmp.lt.s32.totalorder %s184_s17, %s184_s17 }
  0x3d   : > { %p360_p7 = scmp.ne.s32.totalorder %s184_s17, %s359_s19  ;;  %p367_p0 = scmp.lt.s32.totalorder %s359_s19, %s359_s19 }
  0x3f   : > { %p361_p11 = pnand %p360_p7, %p534_p10  ;;  %p368_p1 = por %p367_p0, %p366_p13 }
  0x41   : > { %p362_p12 = pneg %p361_p11 }
  0x43   : > { %p369_p2 = pnand %p368_p1, %p362_p12 }
  0x45   : > { %372 = shalt.err (!%p369_p2)
}
  0x46   : > { %272 = dma.vmem_to_hbm [thread:$0]  (%p534_p10), %s184_s17, 128, %s568_s1, [#allocation4]  }
  0x47   : > { %412 = dma.done.wait (%p534_p10), [#allocation4], 128  }
  0x48   : > { %414 = vsyncadd (%p534_p10), [#allocation4], 4294967168 }
  0x49 PF: > { %s15_s11 = sadd.s32 1, %s437_s11   ;;  %s573_s6 = smov %s421_s7 }
  0x4a   : > { %p12_p3 = scmp.ge.s32.totalorder %s15_s11, 4   ;;  %s574_s7 = smov %s425_s8 }
  0x4b   : > { %s575_s8 = smov %s502_s18  ;;  %s576_s9 = smov %s433_s10 }
  0x4c   : > { %s577_s10 = smov %s579_s13  ;;  %14 = sbr.rel (!%p12_p3) target bundleno = 5 (0x5), region = 70 }
  0x51   :  { %196 = vsyncpa [#allocation3], 1 }
  0x52   :  { %198 = vsyncpa [#allocation3 + $0x1], 1 }
  0x53   :  { %199 = vsyncpa [#allocation4], 1 }
  0x54   :  { %201 = vsyncpa [#allocation4 + $0x1], 1 }

</bundles_post_ra>
